<compile_context>
chip_gen: v5e
topology: v5e:2x2
jax: 0.10.0
libtpu: 0.0.40
codegen_flags: <defaults>
</compile_context>

<pallas_src>
import math
import functools

import jax
import jax.numpy as jnp
from jax.experimental import pallas as pl
from jax.experimental.pallas import tpu as pltpu

# ----------------------------------------------------------------------------
# Config (small shapes consistent with the reference module)
# ----------------------------------------------------------------------------
BATCH       = 2
CHANNELS    = 3                       # patch_dim = 3 * patch_size**2 in the reference
IMAGE_SIZE  = 16
PATCH_SIZE  = 8
NUM_PATCHES = (IMAGE_SIZE // PATCH_SIZE) ** 2       # 4  -> b*n = 8 rows (full sublanes)
PATCH_DIM   = CHANNELS * PATCH_SIZE * PATCH_SIZE    # 192
DIM         = 128                                    # lane-dense feature width
LN_EPS      = 1e-5


# ----------------------------------------------------------------------------
# Fused Pallas kernel: LN(patch_dim) -> Linear -> LN(dim) -> [cls | x] + pos
# aux_ref rows: [0] ln2_gamma, [1] folded linear bias, [2] cls + pos[0],
#               [3:] pos[1:] + ln2_beta
# ----------------------------------------------------------------------------
def _image_embedder_kernel(x_ref, w_ref, aux_ref, o_ref, *, batch, n_patches):
    x = x_ref[...]                                              # (b*n, patch_dim) f32

    # LayerNorm over patch_dim; affine is folded into W/b on the host.
    # E[x^2]-mu^2 form: the two reductions are independent -> XLU pipelines them.
    mu = jnp.mean(x, axis=-1, keepdims=True)
    ms = jnp.mean(x * x, axis=-1, keepdims=True)
    x = (x - mu) * jax.lax.rsqrt(ms - mu * mu + LN_EPS)

    # Linear(patch_dim -> dim) on the MXU, whole batch in one contraction.
    y = jnp.dot(x, w_ref[...], preferred_element_type=jnp.float32) + aux_ref[1:2, :]

    # LayerNorm over dim (beta already merged into the positional rows).
    mu2 = jnp.mean(y, axis=-1, keepdims=True)
    ms2 = jnp.mean(y * y, axis=-1, keepdims=True)
    y = (y - mu2) * jax.lax.rsqrt(ms2 - mu2 * mu2 + LN_EPS) * aux_ref[0:1, :]

    # [cls | y] + pos, assembled in registers and written as ONE dense store.
    cls_tok = aux_ref[2:3, :]                                   # cls + pos[0]      (1, dim)
    pos_patch = aux_ref[3:, :]                                  # pos[1:] + ln2_b   (n, dim)
    pieces = []
    for bi in range(batch):                                     # static unroll, b is tiny
        pieces.append(cls_tok)
        pieces.append(y[bi * n_patches:(bi + 1) * n_patches, :] + pos_patch)
    o_ref[...] = jnp.concatenate(pieces, axis=0)                # (b*(n+1), dim)


# ----------------------------------------------------------------------------
# Wrapper
# ----------------------------------------------------------------------------
def patchify(img, p):
    # Rearrange('b c (h p1) (w p2) -> b (h w) (p1 p2 c)') — layout plumbing only.
    b, c, H, W = img.shape
    h, w = H // p, W // p
    x = img.reshape(b, c, h, p, w, p)
    x = x.transpose(0, 2, 4, 3, 5, 1)                           # b h w p1 p2 c
    return x.reshape(b, h * w, p * p * c)


def image_embedder(img, prm, patch_size):
    patches = patchify(img, patch_size)                         # (b, n, patch_dim)
    b, n, patch_dim = patches.shape
    dim = prm["w_patch"].shape[1]
    x2 = patches.reshape(b * n, patch_dim)                      # 8 rows -> full sublanes

    # Host-side folding of LN1 affine into the linear layer + pos/bias merges.
    w_eff   = prm["w_patch"] * prm["ln1_g"].reshape(-1, 1)      # diag(g1) @ W
    b_eff   = prm["ln1_b"] @ prm["w_patch"] + prm["b_patch"]    # b1 @ W + b        (1, dim)
    cls_eff = prm["cls"] + prm["pos"][0:1]                      # cls + pos[0]      (1, dim)
    pos_eff = prm["pos"][1:] + prm["ln2_b"]                     # pos[1:] + beta2   (n, dim)
    aux = jnp.concatenate([prm["ln2_g"], b_eff, cls_eff, pos_eff], axis=0)  # (3+n, dim)

    kern = functools.partial(_image_embedder_kernel, batch=b, n_patches=n)
    vmem = pltpu.MemorySpace.VMEM

    flat = pl.pallas_call(
        kern,
        out_shape=jax.ShapeDtypeStruct((b * (n + 1), dim), jnp.float32),
        in_specs=[pl.BlockSpec(memory_space=vmem)] * 3,          # whole arrays in VMEM
        out_specs=pl.BlockSpec(memory_space=vmem),
        compiler_params=pltpu.CompilerParams(
            allow_input_fusion=[True, True, True]),              # fuse patchify/fold into inputs
        cost_estimate=pl.CostEstimate(
            flops=2 * (b * n) * patch_dim * dim,
            transcendentals=2 * b * n,
            bytes_accessed=4 * (b * n * patch_dim + patch_dim * dim
                                + (3 + n) * dim + b * (n + 1) * dim)),
    )(x2, w_eff, aux)

    return flat.reshape(b, n + 1, dim)                           # dropout(p=0) -> identity


# ----------------------------------------------------------------------------
# Pure-JAX reference (unfolded params, two-pass variance) for correctness check
# ----------------------------------------------------------------------------
def reference_forward(img, prm, patch_size):
    def ln(t, g, bta):
        mu = t.mean(-1, keepdims=True)
        var = ((t - mu) ** 2).mean(-1, keepdims=True)
        return (t - mu) * jax.lax.rsqrt(var + LN_EPS) * g + bta

    x = patchify(img, patch_size)                               # (b, n, patch_dim)
    x = ln(x, prm["ln1_g"], prm["ln1_b"])
    x = x @ prm["w_patch"] + prm["b_patch"]
    x = ln(x, prm["ln2_g"], prm["ln2_b"])
    b = x.shape[0]
    cls = jnp.broadcast_to(prm["cls"][None], (b, 1, prm["cls"].shape[-1]))
    x = jnp.concatenate([cls, x], axis=1)
    return x + prm["pos"][None]


# ----------------------------------------------------------------------------
# Deterministic parameter initialization (shapes per the reference __init__)
# ----------------------------------------------------------------------------
def init_params(key):
    k = jax.random.split(key, 4)
    bound = 1.0 / math.sqrt(PATCH_DIM)
    w_patch = jax.random.uniform(k[0], (PATCH_DIM, DIM), jnp.float32, -bound, bound)
    b_patch = jax.random.uniform(k[1], (1, DIM), jnp.float32, -bound, bound)
    cls = jax.random.normal(k[2], (1, DIM), jnp.float32)                    # (1,1,d) -> (1,d)
    pos = jax.random.normal(k[3], (NUM_PATCHES + 1, DIM), jnp.float32)      # (1,n+1,d) -> (n+1,d)
    return dict(
        ln1_g=jnp.ones((1, PATCH_DIM), jnp.float32),
        ln1_b=jnp.zeros((1, PATCH_DIM), jnp.float32),
        w_patch=w_patch, b_patch=b_patch,
        ln2_g=jnp.ones((1, DIM), jnp.float32),
        ln2_b=jnp.zeros((1, DIM), jnp.float32),
        cls=cls, pos=pos)


# ----------------------------------------------------------------------------
# Main
# ----------------------------------------------------------------------------
if __name__ == "__main__":
    key = jax.random.PRNGKey(0)
    k_params, k_img = jax.random.split(key)
    params = init_params(k_params)
    img = jax.random.normal(
        k_img, (BATCH, CHANNELS, IMAGE_SIZE, IMAGE_SIZE), jnp.float32)

    fwd = jax.jit(functools.partial(image_embedder, patch_size=PATCH_SIZE))
    out = jax.block_until_ready(fwd(img, params))

    ref = reference_forward(img, params, PATCH_SIZE)

    assert out.shape == (BATCH, NUM_PATCHES + 1, DIM), out.shape
    assert bool(jnp.all(jnp.isfinite(out)))
    assert bool(jnp.allclose(out, ref, atol=1e-4, rtol=1e-4)), \
        float(jnp.max(jnp.abs(out - ref)))
    print("KERNEL_OK")
</pallas_src>

<mosaic_0001>
module attributes {stable_mosaic.version = 11 : i64} {
  func.func @_image_embedder_kernel(%arg0: memref<8x192xf32, #tpu.memory_space<vmem>>, %arg1: memref<192x128xf32, #tpu.memory_space<vmem>>, %arg2: memref<7x128xf32, #tpu.memory_space<vmem>>, %arg3: memref<10x128xf32, #tpu.memory_space<vmem>>) attributes {dimension_semantics = [], scalar_prefetch = 0 : i64, scratch_operands = 0 : i64, tpu.core_type = #tpu.core_type<tc>} {
    %c0 = arith.constant 0 : index
    %c0_0 = arith.constant 0 : index
    %0 = vector.load %arg0[%c0, %c0_0] : memref<8x192xf32, #tpu.memory_space<vmem>>, vector<8x192xf32>
    %cst = arith.constant dense<0.000000e+00> : vector<8xf32>
    %1 = vector.multi_reduction <add>, %0, %cst [1] : vector<8x192xf32> to vector<8xf32>
    %2 = vector.shape_cast %1 : vector<8xf32> to vector<8x1xf32>
    %cst_1 = arith.constant 1.920000e+02 : f32
    %3 = vector.broadcast %cst_1 : f32 to vector<8x1xf32>
    %4 = arith.divf %2, %3 : vector<8x1xf32>
    %5 = arith.mulf %0, %0 : vector<8x192xf32>
    %cst_2 = arith.constant dense<0.000000e+00> : vector<8xf32>
    %6 = vector.multi_reduction <add>, %5, %cst_2 [1] : vector<8x192xf32> to vector<8xf32>
    %7 = vector.shape_cast %6 : vector<8xf32> to vector<8x1xf32>
    %cst_3 = arith.constant 1.920000e+02 : f32
    %8 = vector.broadcast %cst_3 : f32 to vector<8x1xf32>
    %9 = arith.divf %7, %8 : vector<8x1xf32>
    %10 = vector.broadcast %4 : vector<8x1xf32> to vector<8x192xf32>
    %11 = arith.subf %0, %10 : vector<8x192xf32>
    %12 = arith.mulf %4, %4 : vector<8x1xf32>
    %13 = arith.subf %9, %12 : vector<8x1xf32>
    %cst_4 = arith.constant 9.99999974E-6 : f32
    %14 = vector.broadcast %cst_4 : f32 to vector<8x1xf32>
    %15 = arith.addf %13, %14 : vector<8x1xf32>
    %16 = math.rsqrt %15 : vector<8x1xf32>
    %17 = vector.broadcast %16 : vector<8x1xf32> to vector<8x192xf32>
    %18 = arith.mulf %11, %17 : vector<8x192xf32>
    %c0_5 = arith.constant 0 : index
    %c0_6 = arith.constant 0 : index
    %19 = vector.load %arg1[%c0_5, %c0_6] : memref<192x128xf32, #tpu.memory_space<vmem>>, vector<192x128xf32>
    %cst_7 = arith.constant dense<0.000000e+00> : vector<8x128xf32>
    %20 = tpu.matmul %18, %19, %cst_7 {dimension_numbers = #tpu.dot_dimension_numbers<[1], [0], [0], [1], [0, 0, 1, 1], [], []>} : vector<8x192xf32>, vector<192x128xf32>, vector<8x128xf32> -> vector<8x128xf32>
    %c1 = arith.constant 1 : index
    %c0_8 = arith.constant 0 : index
    %21 = vector.load %arg2[%c1, %c0_8] : memref<7x128xf32, #tpu.memory_space<vmem>>, vector<1x128xf32>
    %22 = vector.broadcast %21 : vector<1x128xf32> to vector<8x128xf32>
    %23 = arith.addf %20, %22 : vector<8x128xf32>
    %cst_9 = arith.constant dense<0.000000e+00> : vector<8xf32>
    %24 = vector.multi_reduction <add>, %23, %cst_9 [1] : vector<8x128xf32> to vector<8xf32>
    %25 = vector.shape_cast %24 : vector<8xf32> to vector<8x1xf32>
    %cst_10 = arith.constant 1.280000e+02 : f32
    %26 = vector.broadcast %cst_10 : f32 to vector<8x1xf32>
    %27 = arith.divf %25, %26 : vector<8x1xf32>
    %28 = arith.mulf %23, %23 : vector<8x128xf32>
    %cst_11 = arith.constant dense<0.000000e+00> : vector<8xf32>
    %29 = vector.multi_reduction <add>, %28, %cst_11 [1] : vector<8x128xf32> to vector<8xf32>
    %30 = vector.shape_cast %29 : vector<8xf32> to vector<8x1xf32>
    %cst_12 = arith.constant 1.280000e+02 : f32
    %31 = vector.broadcast %cst_12 : f32 to vector<8x1xf32>
    %32 = arith.divf %30, %31 : vector<8x1xf32>
    %33 = vector.broadcast %27 : vector<8x1xf32> to vector<8x128xf32>
    %34 = arith.subf %23, %33 : vector<8x128xf32>
    %35 = arith.mulf %27, %27 : vector<8x1xf32>
    %36 = arith.subf %32, %35 : vector<8x1xf32>
    %cst_13 = arith.constant 9.99999974E-6 : f32
    %37 = vector.broadcast %cst_13 : f32 to vector<8x1xf32>
    %38 = arith.addf %36, %37 : vector<8x1xf32>
    %39 = math.rsqrt %38 : vector<8x1xf32>
    %40 = vector.broadcast %39 : vector<8x1xf32> to vector<8x128xf32>
    %41 = arith.mulf %34, %40 : vector<8x128xf32>
    %c0_14 = arith.constant 0 : index
    %c0_15 = arith.constant 0 : index
    %42 = vector.load %arg2[%c0_14, %c0_15] : memref<7x128xf32, #tpu.memory_space<vmem>>, vector<1x128xf32>
    %43 = vector.broadcast %42 : vector<1x128xf32> to vector<8x128xf32>
    %44 = arith.mulf %41, %43 : vector<8x128xf32>
    %c2 = arith.constant 2 : index
    %c0_16 = arith.constant 0 : index
    %45 = vector.load %arg2[%c2, %c0_16] : memref<7x128xf32, #tpu.memory_space<vmem>>, vector<1x128xf32>
    %c3 = arith.constant 3 : index
    %c0_17 = arith.constant 0 : index
    %46 = vector.load %arg2[%c3, %c0_17] : memref<7x128xf32, #tpu.memory_space<vmem>>, vector<4x128xf32>
    %47 = vector.extract_strided_slice %44 {offsets = [0, 0], sizes = [4, 128], strides = [1, 1]} : vector<8x128xf32> to vector<4x128xf32>
    %48 = arith.addf %47, %46 : vector<4x128xf32>
    %49 = vector.extract_strided_slice %44 {offsets = [4, 0], sizes = [4, 128], strides = [1, 1]} : vector<8x128xf32> to vector<4x128xf32>
    %50 = arith.addf %49, %46 : vector<4x128xf32>
    %51 = tpu.concatenate %45, %48, %45, %50 in 0 : vector<1x128xf32>, vector<4x128xf32>, vector<1x128xf32>, vector<4x128xf32> -> vector<10x128xf32>
    %c0_18 = arith.constant 0 : index
    %c0_19 = arith.constant 0 : index
    %52 = vector.load %arg3[%c0_18, %c0_19] : memref<10x128xf32, #tpu.memory_space<vmem>>, vector<10x128xf32>
    tpu.vector_store %arg3[%c0_18, %c0_19], %51 {strides = array<i32>} : memref<10x128xf32, #tpu.memory_space<vmem>>, vector<10x128xf32>,
    return
  }
}

</mosaic_0001>

<bundles_post_ra>
// kernel: image_embedder.2
= control target key start
LH: loop header
LB: loop body
LE: loop exit
PB: predicated region body
PF: predicated region fallthrough
CT: control target
= control target key end

     0   :  { %s1052_s0 = inlined_call_operand.vmem [shape: f32[8,192], index: 0, kind: input, shape index: {}]   ;;  %s1053_s1 = inlined_call_operand.vmem [shape: f32[192,128], index: 1, kind: input, shape index: {}]   ;;  %s1054_s2 = inlined_call_operand.vmem [shape: f32[192], index: 2, kind: input, shape index: {}]   ;;  %s1055_s3 = inlined_call_operand.vmem [shape: f32[4,128], index: 3, kind: input, shape index: {}]   ;;  %s1056_s4 = inlined_call_operand.<no memory space> [shape: f32[], index: 4, kind: input, shape index: {}]   ;;  %s1057_s5 = inlined_call_operand.vmem [shape: f32[1,128], index: 5, kind: input, shape index: {}]   ;;  %s1058_s6 = inlined_call_operand.vmem [shape: f32[1,128], index: 6, kind: input, shape index: {}]   ;;  %s1059_s7 = inlined_call_operand.vmem [shape: f32[1,128], index: 7, kind: input, shape index: {}]   ;;  %s1060_s8 = inlined_call_operand.vmem [shape: f32[10,128], index: 8, kind: output, shape index: {}]  }
   0x1   :  { %v869_v0 = vstv %s1056_s4 }
   0x2   :  { %v98_v1 = vlaneseq  ;;  %v879_v6 = vld [vmem:[%s1054_s2] ss:$0 sm:$0xff]  ;;  %v892_v11 = vld [vmem:[%s1052_s0 + $0x8] sm:$0xff]  ;;  %vm575_vm0 = vcmask 523264   ;;  %v919_v23 = vld [vmem:[%s1054_s2 + $0x1] ss:$0 sm:$0xff] }
   0x3   :  { %v897_v12 = vld [vmem:[%s1052_s0] sm:$0xff]  ;;  %v589_v13 = vmul.f32 %v892_v11, %v892_v11  ;;  %v576_v15 = vsel %vm575_vm0, %v892_v11, 0.0  ;;  %vm521_vm1 = vcmask 1044480   ;;  %vm535_vm2 = vcmask 1045504   ;;  %v767_v44 = vld [vmem:[%s1053_s1 + $0x78] sm:$0xff]  ;;  %v766_v48 = vld [vmem:[%s1053_s1 + $0x70] sm:$0xff] }
   0x4   :  { %v871_v2 = vshrl.u32 %v98_v1, 7  ;;  %v588_v14 = vmul.f32 %v897_v12, %v897_v12  ;;  %v577_v18 = vadd.f32 %v576_v15, %v897_v12  ;;  %v515_v26 = vld [vmem:[%s1055_s3] sm:$0xf]  ;;  %vm549_vm3 = vcmask 1046528   ;;  %v765_v49 = vld [vmem:[%s1053_s1 + $0x68] sm:$0xff]  ;;  %v763_v57 = vld [vmem:[%s1053_s1 + $0x58] sm:$0xff] }
   0x5   :  { %v590_v16 = vsel %vm575_vm0, %v589_v13, 0.0  ;;  %v529_v27 = vld [vmem:[%s1057_s5] sm:$0x1]  ;;  %v762_v61 = vld [vmem:[%s1053_s1 + $0x50] sm:$0xff]  ;;  %vm729_vm15 = vcmask 1040384  }
   0x6   :  { %v354_v3 = vadd.s32 120, %v871_v2  ;;  %v320_v4 = vadd.s32 104, %v871_v2  ;;  %v303_v5 = vadd.s32 96, %v871_v2  ;;  %v337_v7 = vadd.s32 112, %v871_v2  ;;  %v543_v28 = vld [vmem:[%s1058_s6] sm:$0x1] }
   0x7   :  { %v286_v8 = vadd.s32 88, %v871_v2  ;;  %v235_v9 = vadd.s32 64, %v871_v2  ;;  %v252_v10 = vadd.s32 72, %v871_v2  ;;  %v269_v17 = vadd.s32 80, %v871_v2  ;;  %v552_v29 = vld [vmem:[%s1059_s7] sm:$0x1] }
   0x8   :  { %787 = vset.pattern.permute.xlu0 %v354_v3  ;;  %789 = vset.pattern.permute.xlu1 %v320_v4  ;;  %v591_v19 = vadd.f32 %v590_v16, %v588_v14  ;;  %v218_v20 = vadd.s32 56, %v871_v2  ;;  %v201_v21 = vadd.s32 48, %v871_v2  ;;  %v184_v22 = vadd.s32 40, %v871_v2  ;;  %v764_v53 = vld [vmem:[%s1053_s1 + $0x60] sm:$0xff]  ;;  %v782_v3 = vld [vmem:[%s1053_s1 + $0xb8] sm:$0xff] }
   0x9   :  { %790 = vset.pattern.permute.xlu2 %v303_v5  ;;  %v167_v24 = vadd.s32 32, %v871_v2  ;;  %v116_v25 = vadd.s32 8, %v871_v2  ;;  %vm556_vm4 = vcmp.lt.s32.totalorder %v871_v2, 1  ;;  %v150_v42 = vadd.s32 24, %v871_v2 }
   0xa   :  { %v557_v33 = vsel %vm556_vm4, %v552_v29, %v869_v0  ;;  %v133_v47 = vadd.s32 16, %v871_v2 }
   0xb   :  { %vm519_vm5 = vcmp.lt.s32.totalorder %v116_v25, 12  ;;  %vm533_vm6 = vcmp.lt.s32.totalorder %v116_v25, 9 }
   0xc   :  { %v520_v30 = vsel %vm519_vm5, %v515_v26, %v869_v0  ;;  %v534_v31 = vsel %vm533_vm6, %v529_v27, %v869_v0  ;;  %v548_v32 = vsel %vm533_vm6, %v543_v28, %v869_v0 }
   0xd   :  { %v522_v34 = vsel %vm521_vm1, %v520_v30, %v869_v0  ;;  %v536_v35 = vsel %vm535_vm2, %v534_v31, %v869_v0  ;;  %v550_v36 = vsel %vm549_vm3, %v548_v32, %v869_v0  ;;  %v761_v0 = vld [vmem:[%s1053_s1 + $0x48] sm:$0xff] }
   0xe   :  { %v537_v37 = vrot.slane %v536_v35, 6  ;;  %v551_v38 = vrot.slane %v550_v36, 7  ;;  %v523_v39 = vrot.slane %v522_v34, 5  ;;  %v778_v32 = vld [vmem:[%s1053_s1 + $0xa8] sm:$0xff] }
  0x10   :  { %356 = vperm.xlu0 %787, %v879_v6   ;;  %322 = vperm.xlu1 %789, %v879_v6   ;;  %v560_v40 = vmax.f32 %v557_v33, %v551_v38 }
  0x11   :  { %305 = vperm.xlu2 %790, %v879_v6  }
  0x12   :  { %v564_v41 = vmax.f32 %v560_v40, %v537_v37  ;;  %v756_v37 = vld [vmem:[%s1053_s1 + $0x20] sm:$0xff] }
  0x14   :  { %v568_v43 = vmax.f32 %v564_v41, %v523_v39  ;;  %v755_v39 = vld [vmem:[%s1053_s1 + $0x18] sm:$0xff] }
  0x16   :  { %572 = vst [vmem:[#allocation23] sm:$0xff] %v568_v43 }
  0x18   :  { %788 = vset.pattern.permute.xlu0 %v337_v7  ;;  %794 = vset.pattern.permute.xlu1 %v235_v9  ;;  %v819_v7 = vmov 192.0   ;;  %v759_v9 = vld [vmem:[%s1053_s1 + $0x38] sm:$0xff] }
  0x19   :  { %793 = vset.pattern.permute.xlu2 %v252_v10  ;;  %811 = vrcp.f32 %v819_v7 }
  0x1f   :  { %v812_v16 = vpop.eup %811 }
  0x20   :  { %339 = vperm.xlu0 %788, %v879_v6   ;;  %vm585_vm7 = vweird.f32 %v812_v16 }
  0x28   :  { %791 = vset.pattern.permute.xlu0 %v286_v8  ;;  %v760_v8 = vld [vmem:[%s1053_s1 + $0x40] sm:$0xff] }
  0x30   :  { %288 = vperm.xlu0 %791, %v879_v6  }
  0x38   :  { %792 = vset.pattern.permute.xlu0 %v269_v17  ;;  %v780_v17 = vld [vmem:[%s1053_s1 + $0xb0] sm:$0xff] }
  0x3a   :  { %578 = vadd.xlane.f32.xlu1 %v577_v18  ;;  %592 = vadd.xlane.f32.xlu2 %v591_v19  ;;  %v581_v18 = vmul.f32 192.0, %v812_v16 }
  0x40   :  { %271 = vperm.xlu0 %792, %v879_v6  }
  0x48   :  { %795 = vset.pattern.permute.xlu0 %v218_v20 }
  0x50   :  { %220 = vperm.xlu0 %795, %v879_v6  }
  0x52   :  { %254 = vperm.xlu2 %793, %v879_v6  }
  0x53   :  { %237 = vperm.xlu1 %794, %v879_v6  }
  0x58   :  { %796 = vset.pattern.permute.xlu0 %v201_v21 }
  0x5a   :  { %797 = vset.pattern.permute.xlu2 %v218_v20 }
  0x5b   :  { %798 = vset.pattern.permute.xlu1 %v184_v22 }
  0x60   :  { %203 = vperm.xlu0 %796, %v879_v6  }
  0x62   :  { %500 = vperm.xlu2 %797, %v919_v23  }
  0x63   :  { %186 = vperm.xlu1 %798, %v879_v6  }
  0x68   :  { %801 = vset.pattern.permute.xlu0 %v184_v22  ;;  %v758_v22 = vld [vmem:[%s1053_s1 + $0x30] sm:$0xff] }
  0x6a   :  { %799 = vset.pattern.permute.xlu2 %v201_v21  ;;  %v582_v21 = vsub.f32 1.0, %v581_v18  ;;  %v809_v18 = vld [vmem:[#allocation23 + $0x1] ss:$0 sm:$0xff] }
  0x6b   :  { %800 = vset.pattern.permute.xlu1 %v167_v24  ;;  %v306_v54 = vpop.permute.xlu2 %305 }
  0x6c   :  { %v309_v56 = vmul.f32 %v764_v53, %v306_v54  ;;  %v583_v26 = vmul.f32 %v812_v16, %v582_v21 }
  0x6e   :  { %v584_v29 = vadd.f32 %v812_v16, %v583_v26 }
  0x70   :  { %464 = vperm.xlu0 %801, %v919_v23   ;;  %v586_v30 = vsel %vm585_vm7, %v812_v16, %v584_v29 }
  0x72   :  { %482 = vperm.xlu2 %799, %v919_v23  }
  0x73   :  { %169 = vperm.xlu1 %800, %v879_v6  }
  0x78   :  { %805 = vset.pattern.permute.xlu0 %v116_v25 }
  0x7a   :  { %802 = vset.pattern.permute.xlu2 %v150_v42 }
  0x7b   :  { %446 = vperm.xlu1 %800, %v919_v23  }
  0x80   :  { %118 = vperm.xlu0 %805, %v879_v6  }
  0x82   :  { %152 = vperm.xlu2 %802, %v879_v6   ;;  %v357_v45 = vpop.permute.xlu0 %356  ;;  %v323_v50 = vpop.permute.xlu1 %322 }
  0x83   :  { %804 = vset.pattern.permute.xlu1 %v150_v42  ;;  %v360_v46 = vmul.f32 %v767_v44, %v357_v45  ;;  %v326_v55 = vmul.f32 %v765_v49, %v323_v50  ;;  %v754_v44 = vld [vmem:[%s1053_s1 + $0x10] sm:$0xff] }
  0x85   :  { %641 = vmatpush.msra.mxu0 %v360_v46  ;;  %v776_v46 = vld [vmem:[%s1053_s1 + $0xa0] sm:$0xff] }
  0x88   :  { %808 = vset.pattern.permute.xlu0 %v218_v20 }
  0x8a   :  { %803 = vset.pattern.permute.xlu2 %v133_v47 }
  0x8b   :  { %428 = vperm.xlu1 %804, %v919_v23  }
  0x92   :  { %v340_v51 = vpop.permute.xlu0 %339  ;;  %135 = vperm.xlu2 %803, %v879_v6  }
  0x93   :  { %v343_v52 = vmul.f32 %v766_v48, %v340_v51  ;;  %806 = vset.pattern.permute.xlu1 %v871_v2  ;;  %v753_v51 = vld [vmem:[%s1053_s1 + $0x8] sm:$0xff] }
  0x95   :  { %642 = vmatpush.msra.mxu0 %v343_v52 }
  0x97   :  { %643 = vmatpush.msra.mxu0 %v326_v55 }
  0x99   :  { %644 = vmatpush.msra.mxu0 %v309_v56  ;;  %v774_v56 = vld [vmem:[%s1053_s1 + $0x98] sm:$0xff] }
  0x9a   :  { %410 = vperm.xlu2 %803, %v919_v23  }
  0x9b   :  { %102 = vperm.xlu1 %806, %v879_v6  }
  0xa2   :  { %v289_v58 = vpop.permute.xlu0 %288  ;;  %807 = vset.pattern.permute.xlu2 %v116_v25  ;;  %v757_v25 = vld [vmem:[%s1053_s1 + $0x28] sm:$0xff] }
  0xa3   :  { %374 = vperm.xlu1 %806, %v919_v23   ;;  %v292_v59 = vmul.f32 %v763_v57, %v289_v58 }
  0xa5   :  { %645 = vmatpush.msra.mxu0 %v292_v59  ;;  %v772_v59 = vld [vmem:[%s1053_s1 + $0x90] sm:$0xff] }
  0xaa   :  { %392 = vperm.xlu2 %807, %v919_v23  }
  0xad   :  { %v593_v60 = vpop.xlane.xlu2 %592  ;;  %v579_v4 = vpop.xlane.xlu1 %578 }
  0xae   :  { %v1002_v31 = vmul.f32 %v586_v30, %v579_v4  ;;  %v594_v36 = vmul.f32 %v593_v60, %v586_v30 }
  0xb0   :  { %v597_v35 = vmul.f32 %v1002_v31, %v1002_v31 }
  0xb2   :  { %v272_v62 = vpop.permute.xlu0 %271  ;;  %v598_v43 = vsub.f32 %v594_v36, %v597_v35 }
  0xb3   :  { %v275_v63 = vmul.f32 %v762_v61, %v272_v62 }
  0xb4   :  { %v599_v45 = vadd.f32 1e-05, %v598_v43 }
  0xb5   :  { %v255_v1 = vpop.permute.xlu2 %254  ;;  %646 = vmatpush.msra.mxu0 %v275_v63 }
  0xb6   :  { %v258_v2 = vmul.f32 %v761_v0, %v255_v1  ;;  %813 = vrsqrt.f32 %v599_v45  ;;  %v770_v0 = vld [vmem:[%s1053_s1 + $0x88] sm:$0xff]  ;;  %vm606_vm9 = vweird.f32 %v599_v45 }
  0xb8   :  { %647 = vmatpush.msra.mxu0 %v258_v2 }
  0xbc   :  { %v814_v54 = vpop.eup %813 }
  0xbd   :  { %v501_v5 = vpop.permute.xlu2 %500  ;;  %v601_v55 = vmul.f32 %v814_v54, %v599_v45  ;;  %vm607_vm8 = vweird.f32 %v814_v54 }
  0xbe   :  { %v504_v6 = vmul.f32 %v782_v3, %v501_v5  ;;  %v96_v5 = vld [vmem:[%s1053_s1] sm:$0xff]  ;;  %vm608_vm10 = vmor %vm606_vm9, %vm607_vm8 }
  0xbf   :  { %v602_v57 = vmul.f32 %v814_v54, %v601_v55 }
  0xc0   :  { %669 = vmatpush.msra.mxu1 %v504_v6 }
  0xc1   :  { %v603_v63 = vmul.f32 0.5, %v602_v57 }
  0xc2   :  { %v221_v13 = vpop.permute.xlu0 %220 }
  0xc3   :  { %v224_v15 = vmul.f32 %v759_v9, %v221_v13  ;;  %v604_v1 = vsub.f32 1.5, %v603_v63  ;;  %v768_v13 = vld [vmem:[%s1053_s1 + $0x80] sm:$0xff] }
  0xc5   :  { %v238_v10 = vpop.permute.xlu1 %237  ;;  %v605_v4 = vmul.f32 %v814_v54, %v604_v1 }
  0xc6   :  { %v241_v14 = vmul.f32 %v760_v8, %v238_v10  ;;  %v595_v8 = vsub.f32 %v897_v12, %v1002_v31 }
  0xc7   :  { %v609_v6 = vsel %vm608_vm10, %v814_v54, %v605_v4 }
  0xc8   :  { %648 = vmatpush.msra.mxu0 %v241_v14  ;;  %v610_v10 = vmul.f32 %v609_v6, %v595_v8  ;;  %v596_v14 = vsub.f32 %v892_v11, %v1002_v31 }
  0xca   :  { %649 = vmatpush.msra.mxu0 %v224_v15 }
  0xcc   :  { %v483_v19 = vpop.permute.xlu2 %482 }
  0xcd   :  { %v486_v20 = vmul.f32 %v780_v17, %v483_v19  ;;  %v611_v17 = vmul.f32 %v609_v6, %v596_v14 }
  0xcf   :  { %670 = vmatpush.msra.mxu1 %v486_v20 }
  0xd2   :  { %v204_v23 = vpop.permute.xlu0 %203 }
  0xd3   :  { %v207_v24 = vmul.f32 %v758_v22, %v204_v23  ;;  %v820_v23 = vmov 128.0  }
  0xd4   :  { %815 = vrcp.f32 %v820_v23 }
  0xd5   :  { %v187_v27 = vpop.permute.xlu1 %186  ;;  %650 = vmatpush.msra.mxu0 %v207_v24 }
  0xd6   :  { %v190_v28 = vmul.f32 %v757_v25, %v187_v27 }
  0xd8   :  { %651 = vmatpush.msra.mxu0 %v190_v28 }
  0xda   :  { %v816_v24 = vpop.eup %815 }
  0xdb   :  { %v684_v25 = vmul.f32 128.0, %v816_v24  ;;  %vm688_vm11 = vweird.f32 %v816_v24 }
  0xdc   :  { %v153_v34 = vpop.permute.xlu2 %152 }
  0xdd   :  { %v156_v42 = vmul.f32 %v755_v39, %v153_v34  ;;  %v685_v26 = vsub.f32 1.0, %v684_v25 }
  0xdf   :  { %v686_v11 = vmul.f32 %v816_v24, %v685_v26 }
  0xe1   :  { %v687_v27 = vadd.f32 %v816_v24, %v686_v11 }
  0xe2   :  { %v465_v33 = vpop.permute.xlu0 %464 }
  0xe3   :  { %v468_v38 = vmul.f32 %v778_v32, %v465_v33  ;;  %v689_v28 = vsel %vm688_vm11, %v816_v24, %v687_v27 }
  0xe5   :  { %v170_v40 = vpop.permute.xlu1 %169  ;;  %671 = vmatpush.msra.mxu1 %v468_v38 }
  0xe6   :  { %v173_v41 = vmul.f32 %v756_v37, %v170_v40 }
  0xe8   :  { %652 = vmatpush.msra.mxu0 %v173_v41  ;;  %v714_v41 = vld [vmem:[#allocation23 + $0x3] sm:$0xf] }
  0xea   :  { %653 = vmatpush.msra.mxu0 %v156_v42 }
  0xec   :  { %v136_v47 = vpop.permute.xlu2 %135 }
  0xed   :  { %v447_v48 = vpop.permute.xlu1 %446  ;;  %v139_v49 = vmul.f32 %v754_v44, %v136_v47  ;;  %v810_v44 = vld [vmem:[#allocation23] ss:$0 sm:$0xff] }
  0xee   :  { %v450_v50 = vmul.f32 %v776_v46, %v447_v48  ;;  %v717_v46 = vrot.slane %v714_v41, 4  ;;  %v713_v48 = vld [vmem:[#allocation23 + $0x2] sm:$0x1] }
  0xef   :  { %654 = vmatpush.msra.mxu0 %v139_v49 }
  0xf0   :  { %672 = vmatpush.msra.mxu1 %v450_v50 }
  0xf2   :  { %v119_v52 = vpop.permute.xlu0 %118 }
  0xf3   :  { %v122_v53 = vmul.f32 %v753_v51, %v119_v52  ;;  %v724_v52 = vrot.slane %v713_v48, 3 }
  0xf4   :  { %v411_v58 = vpop.permute.xlu2 %410 }
  0xf5   :  { %655 = vmatpush.msra.mxu0 %v122_v53  ;;  %v414_v62 = vmul.f32 %v772_v59, %v411_v58 }
  0xfd   :  { %v429_v60 = vpop.permute.xlu1 %428 }
  0xfe   :  { %v432_v61 = vmul.f32 %v774_v56, %v429_v60 }
 0x100   :  { %673 = vmatpush.msra.mxu1 %v432_v61 }
 0x102   :  { %674 = vmatpush.msra.mxu1 %v414_v62 }
 0x104   :  { %v393_v2 = vpop.permute.xlu2 %392 }
 0x105   :  { %v396_v3 = vmul.f32 %v770_v0, %v393_v2 }
 0x107   :  { %675 = vmatpush.msra.mxu1 %v396_v3 }
 0x10d   :  { %v103_v7 = vpop.permute.xlu1 %102 }
 0x10e   :  { %v106_v9 = vmul.f32 %v103_v7, %v96_v5 }
 0x110   :  { %656 = vmatpush.msra.mxu0 %v106_v9 }
 0x111   :  { %657 = vmatmul.f32.vlgmr.msra.gmra.mxu0 %v610_v10 }
 0x115   :  { %v375_v15 = vpop.permute.xlu1 %374 }
 0x116   :  { %v378_v16 = vmul.f32 %v768_v13, %v375_v15 }
 0x118   :  { %676 = vmatpush.msra.mxu1 %v378_v16 }
 0x119   :  { %784 = vmatmul.msk.f32.vlgmr.msra.gmra.mxu1 %vm575_vm0, %v611_v17 }
 0x18e   :  { %v658_v19 = vpop.f32.mrf.mxu0 }
 0x18f   :  { %v659_v12 = vadd.f32 %v809_v18, %v658_v19 }
 0x196   :  { %v678_v20 = vpop.f32.mrf.mxu1 }
 0x197   :  { %v679_v21 = vadd.f32 %v678_v20, %v659_v12 }
 0x199   :  { %681 = vadd.xlane.f32.xlu0 %v679_v21  ;;  %v691_v22 = vmul.f32 %v679_v21, %v679_v21 }
 0x19b   :  { %692 = vadd.xlane.f32.xlu2 %v691_v22 }
 0x20c   :  { %v682_v29 = vpop.xlane.xlu0 %681 }
 0x20d   :  { %v690_v30 = vmul.f32 %v689_v28, %v682_v29 }
 0x20e   :  { %v693_v31 = vpop.xlane.xlu2 %692 }
 0x20f   :  { %v696_v32 = vmul.f32 %v690_v30, %v690_v30  ;;  %v694_v33 = vmul.f32 %v693_v31, %v689_v28  ;;  %v695_v43 = vsub.f32 %v679_v21, %v690_v30 }
 0x211   :  { %v697_v34 = vsub.f32 %v694_v33, %v696_v32 }
 0x213   :  { %v698_v35 = vadd.f32 1e-05, %v697_v34 }
 0x215   :  { %817 = vrsqrt.f32 %v698_v35  ;;  %vm705_vm13 = vweird.f32 %v698_v35 }
 0x21b   :  { %v818_v36 = vpop.eup %817 }
 0x21c   :  { %v700_v37 = vmul.f32 %v818_v36, %v698_v35  ;;  %vm706_vm12 = vweird.f32 %v818_v36 }
 0x21d   :  { %vm707_vm14 = vmor %vm705_vm13, %vm706_vm12 }
 0x21e   :  { %v701_v38 = vmul.f32 %v818_v36, %v700_v37 }
 0x220   :  { %v702_v39 = vmul.f32 0.5, %v701_v38 }
 0x222   :  { %v703_v40 = vsub.f32 1.5, %v702_v39 }
 0x224   :  { %v704_v42 = vmul.f32 %v818_v36, %v703_v40 }
 0x226   :  { %v708_v45 = vsel %vm707_vm14, %v818_v36, %v704_v42 }
 0x227   :  { %v709_v47 = vmul.f32 %v708_v45, %v695_v43 }
 0x229   :  { %v712_v49 = vmul.f32 %v810_v44, %v709_v47 }
 0x22b   :  { %v715_v50 = vadd.f32 %v714_v41, %v712_v49  ;;  %v719_v51 = vadd.f32 %v717_v46, %v712_v49 }
 0x22d   :  { %v721_v53 = vrot.slane %v715_v50, 7  ;;  %v727_v54 = vrot.slane %v719_v51, 6 }
 0x22f   :  { %v730_v55 = vsel %vm729_vm15, %v713_v48, %v721_v53  ;;  %736 = vst [vmem:[%s1060_s8 + $0x8] sm:$0x3] %v727_v54 }
 0x230   :  { %v732_v56 = vsel %vm521_vm1, %v730_v55, %v724_v52 }
 0x231   :  { %v734_v57 = vsel %vm535_vm2, %v732_v56, %v727_v54 }
 0x232   :  { %735 = vst [vmem:[%s1060_s8] sm:$0xff] %v734_v57 }

</bundles_post_ra>
